<compile_context>
chip_gen: v6e
topology: v6e:2x2x1
jax: 0.10.0
libtpu: 0.0.40
codegen_flags: <defaults>
</compile_context>

<pallas_src>
import numpy as np
import jax
import jax.numpy as jnp
from jax.experimental import pallas as pl
from jax.experimental.pallas import tpu as pltpu

try:  # prefer the C implementation when present
    from scipy.optimize import linear_sum_assignment as _scipy_lsa
except Exception:  # pragma: no cover
    _scipy_lsa = None


def _round_up(x, m):
    return ((x + m - 1) // m) * m


# ----------------------------------------------------------------------------
# Pallas kernel: per-batch DETR-style matching cost block
#   C_b = w_bbox * cdist_L1(boxes_b, tgt_boxes_b)
#       + w_class * (pos_focal - neg_focal)[:, tgt_ids_b]
#       + w_giou * (-generalized_box_iou(xyxy(boxes_b), xyxy(tgt_boxes_b)))
# ----------------------------------------------------------------------------
def _make_cost_kernel(w_class, w_bbox, w_giou, gather_first):
    alpha = 0.25
    eps = 1e-8
    # Fold w_class into the focal constants (saves a full-tile multiply).
    c_pos = w_class * alpha
    c_neg = w_class * (1.0 - alpha)

    def focal_diff(x):
        # gamma == 2 -> explicit squares on the VPU; sigmoid/log on the EUP.
        p = jax.nn.sigmoid(x)
        q = 1.0 - p
        pos = c_pos * (q * q) * (-jnp.log(p + eps))
        neg = c_neg * (p * p) * (-jnp.log(q + eps))
        return pos - neg

    def cost_kernel(logits_ref, boxes_ref, onehot_t_ref, tboxes_ref, out_ref):
        onehot_t = onehot_t_ref[0]                              # [C_pad, Tp] bf16
        if gather_first:
            # Large vocab (C_pad > Tp): gather raw logits per (query, target)
            # on the MXU, then do the focal transform on the [tq, Tp] tile.
            g = jnp.dot(logits_ref[0].astype(jnp.bfloat16), onehot_t,
                        preferred_element_type=jnp.float32)     # [tq, Tp]
            cost = focal_diff(g)
        else:
            # Small vocab: focal on [tq, C_pad], then one-hot gather on the MXU.
            # bf16 operands -> no multi-pass f32 matmul; one-hot is exact in bf16.
            diff = focal_diff(logits_ref[0].astype(jnp.float32))
            cost = jnp.dot(diff.astype(jnp.bfloat16), onehot_t,
                           preferred_element_type=jnp.float32)  # [tq, Tp]

        # ---- pairwise box costs (VPU rank-1 broadcasts, one accumulator) ----
        ob = boxes_ref[0].astype(jnp.float32)                   # [tq, 4] cxcywh
        tb = tboxes_ref[0]                                      # [8, Tp] rows 0..3 = cx,cy,w,h
        ocx, ocy, ow, oh = ob[:, 0:1], ob[:, 1:2], ob[:, 2:3], ob[:, 3:4]   # [tq,1]
        tcx, tcy, tw, th = tb[0:1, :], tb[1:2, :], tb[2:3, :], tb[3:4, :]   # [1,Tp]

        # L1 cdist
        cost = cost + w_bbox * (jnp.abs(ocx - tcx) + jnp.abs(ocy - tcy)
                                + jnp.abs(ow - tw) + jnp.abs(oh - th))

        # GIoU, fused into the accumulator; divides -> EUP approx reciprocals.
        ox0, oy0 = ocx - 0.5 * ow, ocy - 0.5 * oh
        ox1, oy1 = ocx + 0.5 * ow, ocy + 0.5 * oh
        tx0, ty0 = tcx - 0.5 * tw, tcy - 0.5 * th
        tx1, ty1 = tcx + 0.5 * tw, tcy + 0.5 * th

        inter = (jnp.maximum(jnp.minimum(ox1, tx1) - jnp.maximum(ox0, tx0), 0.0)
                 * jnp.maximum(jnp.minimum(oy1, ty1) - jnp.maximum(oy0, ty0), 0.0))
        union = ow * oh + tw * th - inter
        area_enc = (jnp.maximum(jnp.maximum(ox1, tx1) - jnp.minimum(ox0, tx0), 0.0)
                    * jnp.maximum(jnp.maximum(oy1, ty1) - jnp.minimum(oy0, ty0), 0.0))
        r_union = pl.reciprocal(union, approx=True)
        r_enc = pl.reciprocal(area_enc, approx=True)
        # -giou == (area_enc - union)/area_enc - inter/union  (negate folded)
        out_ref[0] = cost + w_giou * ((area_enc - union) * r_enc - inter * r_union)

    return cost_kernel


def compute_cost_blocks(logits_p, boxes_p, onehot_t, tboxes_t,
                        w_class=1.0, w_bbox=1.0, w_giou=1.0, tq=8):
    """Per-batch block-diagonal cost blocks.

    logits_p : [bs, NQp, C_pad]  padded pred logits
    boxes_p  : [bs, NQp, 4]      padded pred boxes (cxcywh)
    onehot_t : [bs, C_pad, Tp]   per-batch one-hot labels (bf16, pre-transposed)
    tboxes_t : [bs, 8, Tp]       per-batch target boxes, rows 0..3 = cx,cy,w,h
    Returns  : [bs, NQp, Tp]     float32 cost blocks.
    """
    bs, NQp, C_pad = logits_p.shape
    Tp = onehot_t.shape[-1]
    assert NQp % tq == 0 and tq % 8 == 0
    assert Tp % 128 == 0 and C_pad % 128 == 0
    assert onehot_t.shape == (bs, C_pad, Tp) and tboxes_t.shape == (bs, 8, Tp)

    gather_first = C_pad > Tp
    kernel = _make_cost_kernel(float(w_class), float(w_bbox), float(w_giou),
                               gather_first)

    # VMEM: 2 pipeline buffers per operand (one-hot is bf16; boxes lane-pad to 128).
    per_step = (tq * C_pad * 4 + tq * 128 * 4 + C_pad * Tp * 2
                + 8 * Tp * 4 + tq * Tp * 4)
    vmem_limit = int(min(max(2 * per_step + (1 << 20), 8 << 20), 32 << 20))
    # TODO(synk): for very large C_pad*Tp (LVIS-scale vocab + many targets) add a
    #             Tp lane grid axis so the one-hot block is tiled, not resident.

    return pl.pallas_call(
        kernel,
        out_shape=jax.ShapeDtypeStruct((bs, NQp, Tp), jnp.float32),
        grid_spec=pltpu.PrefetchScalarGridSpec(
            num_scalar_prefetch=0,
            # batch outer -> per-batch one-hot / tgt-box blocks keep the same
            # block index across the inner query axis (no re-DMA per step).
            grid=(bs, NQp // tq),
            in_specs=[
                pl.BlockSpec((1, tq, C_pad), lambda b, i: (b, i, 0)),  # pred logits
                pl.BlockSpec((1, tq, 4), lambda b, i: (b, i, 0)),      # pred boxes
                pl.BlockSpec((1, C_pad, Tp), lambda b, i: (b, 0, 0)),  # one-hot^T
                pl.BlockSpec((1, 8, Tp), lambda b, i: (b, 0, 0)),      # tgt boxes^T
            ],
            out_specs=pl.BlockSpec((1, tq, Tp), lambda b, i: (b, i, 0)),
        ),
        compiler_params=pltpu.CompilerParams(
            dimension_semantics=("parallel", "parallel"),
            vmem_limit_bytes=vmem_limit),
    )(logits_p, boxes_p, onehot_t, tboxes_t)


# ----------------------------------------------------------------------------
# Host-side Hungarian algorithm (scipy when available, numpy fallback).
# TODO(synk): sequential augmenting-path assignment has no clean Pallas
#             equivalent; it runs on host over the kernel-computed cost blocks.
# ----------------------------------------------------------------------------
def _linear_sum_assignment_np(cost):
    cost = np.asarray(cost, dtype=np.float64)
    transposed = False
    if cost.shape[0] > cost.shape[1]:
        cost = cost.T
        transposed = True
    n, m = cost.shape  # n <= m
    INF = float("inf")
    u = [0.0] * (n + 1)
    v = [0.0] * (m + 1)
    p = [0] * (m + 1)
    way = [0] * (m + 1)
    for i in range(1, n + 1):
        p[0] = i
        j0 = 0
        minv = [INF] * (m + 1)
        used = [False] * (m + 1)
        while True:
            used[j0] = True
            i0 = p[j0]
            delta = INF
            j1 = 0
            for j in range(1, m + 1):
                if not used[j]:
                    cur = cost[i0 - 1][j - 1] - u[i0] - v[j]
                    if cur < minv[j]:
                        minv[j] = cur
                        way[j] = j0
                    if minv[j] < delta:
                        delta = minv[j]
                        j1 = j
            for j in range(m + 1):
                if used[j]:
                    u[p[j]] += delta
                    v[j] -= delta
                else:
                    minv[j] -= delta
            j0 = j1
            if p[j0] == 0:
                break
        while True:
            j1 = way[j0]
            p[j0] = p[j1]
            j0 = j1
            if j0 == 0:
                break
    rows, cols = [], []
    for j in range(1, m + 1):
        if p[j] != 0:
            rows.append(p[j] - 1)
            cols.append(j - 1)
    rows = np.asarray(rows, dtype=np.int64)
    cols = np.asarray(cols, dtype=np.int64)
    if transposed:
        rows, cols = cols, rows
    order = np.argsort(rows)
    return rows[order], cols[order]


def linear_sum_assignment(cost):
    if _scipy_lsa is not None:
        r, c = _scipy_lsa(np.asarray(cost))
        return np.asarray(r, np.int64), np.asarray(c, np.int64)
    return _linear_sum_assignment_np(cost)


# ----------------------------------------------------------------------------
# Module-equivalent wrapper
# ----------------------------------------------------------------------------
class HungarianMatcherTopN:
    def __init__(self, cost_class=1.0, cost_bbox=1.0, cost_giou=1.0,
                 cost_top_k=1, top_K_matching_method="closest"):
        assert (cost_class != 0 or cost_bbox != 0 or cost_giou != 0) and cost_top_k != 0
        self.cost_class = cost_class
        self.cost_bbox = cost_bbox
        self.cost_giou = cost_giou
        self.cost_top_k = cost_top_k
        self.top_K_matching_method = top_K_matching_method
        self._last_C = None   # per-batch sliced cost blocks (debug / verification)

    def __call__(self, outputs, targets):
        pred_logits = outputs["pred_logits"]   # [bs, nq, num_classes]
        pred_boxes = outputs["pred_boxes"]     # [bs, nq, 4]
        bs, num_queries, num_classes = pred_logits.shape

        sizes = [int(t["boxes"].shape[0]) for t in targets]
        T_max = max(sizes) if sizes else 0

        if T_max == 0:  # degenerate: no targets anywhere
            empty = np.zeros((0,), np.int64)
            indices = [(empty.copy(), empty.copy()) for _ in range(bs)]
            top_k = ([(empty.copy(), empty.copy()) for _ in range(bs)]
                     if (self.cost_top_k > 1 and self.top_K_matching_method == "closest")
                     else [])
            self._last_C = [np.zeros((num_queries, 0), np.float32) for _ in range(bs)]
            return indices, top_k

        # Row tiling: cap tq at 64 (vreg pressure / v5e vst slot), minimise padding.
        n_steps = -(-num_queries // 64)
        tq = _round_up(-(-num_queries // n_steps), 8)
        NQp = n_steps * tq
        Tp = _round_up(T_max, 128)             # lane-dense output stores
        C_pad = _round_up(num_classes, 128)    # lane-dense logits / full MXU K

        logits_p = jnp.pad(pred_logits,
                           ((0, 0), (0, NQp - num_queries), (0, C_pad - num_classes)))
        boxes_p = jnp.pad(pred_boxes, ((0, 0), (0, NQp - num_queries), (0, 0)))

        # Target packing on host (numpy), one device transfer per array.
        onehot_np = np.zeros((bs, C_pad, Tp), np.float32)
        tboxes_np = np.zeros((bs, 8, Tp), np.float32)
        tboxes_np[:, 0:2, :] = 0.5   # dummy unit boxes in padded columns keep
        tboxes_np[:, 2:4, :] = 1.0   # union/area_enc > 0 under approx reciprocals
        for b, t in enumerate(targets):
            s = sizes[b]
            if s > 0:
                lab = np.asarray(jax.device_get(t["labels"])).astype(np.int64)
                onehot_np[b, lab, np.arange(s)] = 1.0
                tboxes_np[b, :4, :s] = np.asarray(jax.device_get(t["boxes"]),
                                                  np.float32).T
        onehot_t = jnp.asarray(onehot_np, dtype=jnp.bfloat16)  # one-hot exact in bf16
        tboxes_t = jnp.asarray(tboxes_np)

        # Hot path: Pallas kernel computes only the per-batch cost blocks.
        C_blocks = compute_cost_blocks(logits_p, boxes_p, onehot_t, tboxes_t,
                                       w_class=self.cost_class,
                                       w_bbox=self.cost_bbox,
                                       w_giou=self.cost_giou, tq=tq)
        C_np = np.asarray(jax.block_until_ready(C_blocks))     # [bs, NQp, Tp]

        indices, top_k, c_list = [], [], []
        top = min(self.cost_top_k, num_queries)
        for i in range(bs):
            c_i = C_np[i, :num_queries, :sizes[i]]             # [nq, sizes[i]]
            c_list.append(c_i)
            indices.append(linear_sum_assignment(c_i))
            if self.cost_top_k > 1 and self.top_K_matching_method == "closest":
                idx = np.argsort(c_i, axis=0, kind="stable")[:top]   # [top, sizes[i]]
                cols = idx.flatten().astype(np.int64)
                rows = np.tile(np.arange(sizes[i], dtype=np.int64), top)
                top_k.append((cols, rows))
        # TODO(synk): 'bipartite' top-K variant (repeated-column assignment) not ported.

        self._last_C = c_list
        indices = [(np.asarray(r, dtype=np.int64), np.asarray(c, dtype=np.int64))
                   for r, c in indices]
        return indices, top_k


# ----------------------------------------------------------------------------
# Pure-numpy reference of the (full) cost matrix for a correctness check.
# ----------------------------------------------------------------------------
def reference_cost_matrix(logits_flat, boxes_flat, tgt_ids, tgt_bbox,
                          w_class, w_bbox, w_giou):
    lg = np.asarray(logits_flat, dtype=np.float64)
    ob = np.asarray(boxes_flat, dtype=np.float64)
    tb = np.asarray(tgt_bbox, dtype=np.float64)
    ti = np.asarray(tgt_ids)
    prob = 1.0 / (1.0 + np.exp(-lg))
    alpha, gamma = 0.25, 2.0
    neg = (1 - alpha) * prob ** gamma * -np.log(1 - prob + 1e-8)
    pos = alpha * (1 - prob) ** gamma * -np.log(prob + 1e-8)
    cost_class = (pos - neg)[:, ti]
    cost_bbox = np.abs(ob[:, None, :] - tb[None, :, :]).sum(-1)

    def to_xyxy(b):
        cx, cy, w, h = b[:, 0], b[:, 1], b[:, 2], b[:, 3]
        return np.stack([cx - 0.5 * w, cy - 0.5 * h, cx + 0.5 * w, cy + 0.5 * h], -1)

    A, B = to_xyxy(ob), to_xyxy(tb)
    area_a = (A[:, 2] - A[:, 0]) * (A[:, 3] - A[:, 1])
    area_b = (B[:, 2] - B[:, 0]) * (B[:, 3] - B[:, 1])
    lt = np.maximum(A[:, None, :2], B[None, :, :2])
    rb = np.minimum(A[:, None, 2:], B[None, :, 2:])
    wh = np.clip(rb - lt, 0, None)
    inter = wh[..., 0] * wh[..., 1]
    union = area_a[:, None] + area_b[None, :] - inter
    iou = inter / union
    lt2 = np.minimum(A[:, None, :2], B[None, :, :2])
    rb2 = np.maximum(A[:, None, 2:], B[None, :, 2:])
    wh2 = np.clip(rb2 - lt2, 0, None)
    area_enc = wh2[..., 0] * wh2[..., 1]
    giou = iou - (area_enc - union) / area_enc
    return w_bbox * cost_bbox + w_class * cost_class + w_giou * (-giou)


if __name__ == "__main__":
    key = jax.random.PRNGKey(0)
    bs, num_queries, num_classes = 2, 8, 32
    sizes = [5, 3]

    k1, k2, k3, k4 = jax.random.split(key, 4)
    pred_logits = jax.random.normal(k1, (bs, num_queries, num_classes), jnp.float32)
    cxcy = jax.random.uniform(k2, (bs, num_queries, 2), minval=0.2, maxval=0.8)
    wh = jax.random.uniform(k3, (bs, num_queries, 2), minval=0.1, maxval=0.3)
    pred_boxes = jnp.concatenate([cxcy, wh], axis=-1)

    targets = []
    tk = k4
    for s in sizes:
        tk, ka, kb, kc = jax.random.split(tk, 4)
        labels = jax.random.randint(ka, (s,), 0, num_classes)
        tcxcy = jax.random.uniform(kb, (s, 2), minval=0.2, maxval=0.8)
        twh = jax.random.uniform(kc, (s, 2), minval=0.1, maxval=0.3)
        targets.append({"labels": labels, "boxes": jnp.concatenate([tcxcy, twh], -1)})

    matcher = HungarianMatcherTopN(cost_class=1.0, cost_bbox=1.0, cost_giou=1.0,
                                   cost_top_k=2, top_K_matching_method="closest")
    outputs = {"pred_logits": pred_logits, "pred_boxes": pred_boxes}
    indices, top_k = matcher(outputs, targets)

    # Correctness check of the kernel-computed cost blocks against the
    # full-matrix numpy reference (block-diagonal slices). Tolerance accounts
    # for the bf16 MXU operands and EUP approx reciprocals.
    logits_flat = pred_logits.reshape(bs * num_queries, num_classes)
    boxes_flat = pred_boxes.reshape(bs * num_queries, 4)
    tgt_ids = jnp.concatenate([t["labels"] for t in targets], 0)
    tgt_bbox = jnp.concatenate([t["boxes"] for t in targets], 0)
    C_ref = reference_cost_matrix(logits_flat, boxes_flat, tgt_ids, tgt_bbox,
                                  1.0, 1.0, 1.0).reshape(bs, num_queries, -1)
    col_starts = np.cumsum([0] + sizes)
    for i in range(bs):
        ref_blk = C_ref[i, :, col_starts[i]:col_starts[i + 1]]
        got_blk = matcher._last_C[i]
        assert got_blk.shape == ref_blk.shape
        assert np.all(np.isfinite(got_blk)), f"block {i} has non-finite entries"
        assert np.allclose(got_blk, ref_blk, rtol=2e-2, atol=2e-2), f"block {i} mismatch"

    assert len(indices) == bs and len(top_k) == bs
    for (r, c), s in zip(indices, sizes):
        assert len(r) == len(c) == min(num_queries, s)
    for (cols, rows), s in zip(top_k, sizes):
        assert len(cols) == len(rows) == min(2, num_queries) * s

    print("KERNEL_OK")
</pallas_src>

<mosaic_0001>
module attributes {stable_mosaic.version = 11 : i64} {
  func.func @cost_kernel(%arg0: i32, %arg1: i32, %arg2: memref<1x8x128xf32, #tpu.memory_space<vmem>>, %arg3: memref<1x8x4xf32, #tpu.memory_space<vmem>>, %arg4: memref<1x128x128xbf16, #tpu.memory_space<vmem>>, %arg5: memref<1x8x128xf32, #tpu.memory_space<vmem>>, %arg6: memref<1x8x128xf32, #tpu.memory_space<vmem>>) attributes {dimension_semantics = [#tpu.dimension_semantics<parallel>, #tpu.dimension_semantics<parallel>], iteration_bounds = array<i64: 2, 1>, scalar_prefetch = 0 : i64, scratch_operands = 0 : i64, tpu.core_type = #tpu.core_type<tc>, window_params = [{transform_indices = @transform_0, window_bounds = array<i64: 1, 8, 128>}, {transform_indices = @transform_1, window_bounds = array<i64: 1, 8, 4>}, {transform_indices = @transform_2, window_bounds = array<i64: 1, 128, 128>}, {transform_indices = @transform_3, window_bounds = array<i64: 1, 8, 128>}, {transform_indices = @transform_4, window_bounds = array<i64: 1, 8, 128>}]} {
    %c0 = arith.constant 0 : index
    %c0_0 = arith.constant 0 : index
    %c0_1 = arith.constant 0 : index
    %0 = vector.load %arg4[%c0, %c0_0, %c0_1] : memref<1x128x128xbf16, #tpu.memory_space<vmem>>, vector<1x128x128xbf16>
    %1 = vector.shape_cast %0 : vector<1x128x128xbf16> to vector<128x128xbf16>
    %c0_2 = arith.constant 0 : index
    %c0_3 = arith.constant 0 : index
    %c0_4 = arith.constant 0 : index
    %2 = vector.load %arg2[%c0_2, %c0_3, %c0_4] : memref<1x8x128xf32, #tpu.memory_space<vmem>>, vector<1x8x128xf32>
    %3 = vector.shape_cast %2 : vector<1x8x128xf32> to vector<8x128xf32>
    %4 = arith.negf %3 : vector<8x128xf32>
    %5 = math.exp %4 : vector<8x128xf32>
    %cst = arith.constant 1.000000e+00 : f32
    %6 = vector.broadcast %cst : f32 to vector<8x128xf32>
    %7 = arith.addf %6, %5 : vector<8x128xf32>
    %8 = arith.divf %6, %7 : vector<8x128xf32>
    %cst_5 = arith.constant 1.000000e+00 : f32
    %9 = vector.broadcast %cst_5 : f32 to vector<8x128xf32>
    %10 = arith.subf %9, %8 : vector<8x128xf32>
    %11 = arith.mulf %10, %10 : vector<8x128xf32>
    %cst_6 = arith.constant 2.500000e-01 : f32
    %12 = vector.broadcast %cst_6 : f32 to vector<8x128xf32>
    %13 = arith.mulf %12, %11 : vector<8x128xf32>
    %cst_7 = arith.constant 9.99999993E-9 : f32
    %14 = vector.broadcast %cst_7 : f32 to vector<8x128xf32>
    %15 = arith.addf %8, %14 : vector<8x128xf32>
    %16 = math.log %15 : vector<8x128xf32>
    %cst_8 = arith.constant 0.000000e+00 : f32
    %17 = vector.broadcast %cst_8 : f32 to vector<8x128xf32>
    %18 = arith.subf %17, %16 : vector<8x128xf32>
    %19 = arith.mulf %13, %18 : vector<8x128xf32>
    %20 = arith.mulf %8, %8 : vector<8x128xf32>
    %cst_9 = arith.constant 7.500000e-01 : f32
    %21 = vector.broadcast %cst_9 : f32 to vector<8x128xf32>
    %22 = arith.mulf %21, %20 : vector<8x128xf32>
    %cst_10 = arith.constant 9.99999993E-9 : f32
    %23 = vector.broadcast %cst_10 : f32 to vector<8x128xf32>
    %24 = arith.addf %10, %23 : vector<8x128xf32>
    %25 = math.log %24 : vector<8x128xf32>
    %cst_11 = arith.constant 0.000000e+00 : f32
    %26 = vector.broadcast %cst_11 : f32 to vector<8x128xf32>
    %27 = arith.subf %26, %25 : vector<8x128xf32>
    %28 = arith.mulf %22, %27 : vector<8x128xf32>
    %29 = arith.subf %19, %28 : vector<8x128xf32>
    %30 = arith.truncf %29 : vector<8x128xf32> to vector<8x128xbf16>
    %cst_12 = arith.constant dense<0.000000e+00> : vector<8x128xf32>
    %31 = tpu.matmul %30, %1, %cst_12 {dimension_numbers = #tpu.dot_dimension_numbers<[1], [0], [0], [1], [0, 0, 1, 1], [], []>} : vector<8x128xbf16>, vector<128x128xbf16>, vector<8x128xf32> -> vector<8x128xf32>
    %c0_13 = arith.constant 0 : index
    %c0_14 = arith.constant 0 : index
    %c0_15 = arith.constant 0 : index
    %32 = vector.load %arg3[%c0_13, %c0_14, %c0_15] : memref<1x8x4xf32, #tpu.memory_space<vmem>>, vector<1x8x4xf32>
    %33 = vector.shape_cast %32 : vector<1x8x4xf32> to vector<8x4xf32>
    %c0_16 = arith.constant 0 : index
    %c0_17 = arith.constant 0 : index
    %c0_18 = arith.constant 0 : index
    %34 = vector.load %arg5[%c0_16, %c0_17, %c0_18] : memref<1x8x128xf32, #tpu.memory_space<vmem>>, vector<1x8x128xf32>
    %35 = vector.shape_cast %34 : vector<1x8x128xf32> to vector<8x128xf32>
    %36 = vector.extract_strided_slice %33 {offsets = [0, 0], sizes = [8, 1], strides = [1, 1]} : vector<8x4xf32> to vector<8x1xf32>
    %37 = vector.extract_strided_slice %33 {offsets = [0, 1], sizes = [8, 1], strides = [1, 1]} : vector<8x4xf32> to vector<8x1xf32>
    %38 = vector.extract_strided_slice %33 {offsets = [0, 2], sizes = [8, 1], strides = [1, 1]} : vector<8x4xf32> to vector<8x1xf32>
    %39 = vector.extract_strided_slice %33 {offsets = [0, 3], sizes = [8, 1], strides = [1, 1]} : vector<8x4xf32> to vector<8x1xf32>
    %40 = vector.extract_strided_slice %35 {offsets = [0, 0], sizes = [1, 128], strides = [1, 1]} : vector<8x128xf32> to vector<1x128xf32>
    %41 = vector.extract_strided_slice %35 {offsets = [1, 0], sizes = [1, 128], strides = [1, 1]} : vector<8x128xf32> to vector<1x128xf32>
    %42 = vector.extract_strided_slice %35 {offsets = [2, 0], sizes = [1, 128], strides = [1, 1]} : vector<8x128xf32> to vector<1x128xf32>
    %43 = vector.extract_strided_slice %35 {offsets = [3, 0], sizes = [1, 128], strides = [1, 1]} : vector<8x128xf32> to vector<1x128xf32>
    %44 = vector.broadcast %36 : vector<8x1xf32> to vector<8x128xf32>
    %45 = vector.broadcast %40 : vector<1x128xf32> to vector<8x128xf32>
    %46 = arith.subf %44, %45 : vector<8x128xf32>
    %47 = math.absf %46 : vector<8x128xf32>
    %48 = vector.broadcast %37 : vector<8x1xf32> to vector<8x128xf32>
    %49 = vector.broadcast %41 : vector<1x128xf32> to vector<8x128xf32>
    %50 = arith.subf %48, %49 : vector<8x128xf32>
    %51 = math.absf %50 : vector<8x128xf32>
    %52 = arith.addf %47, %51 : vector<8x128xf32>
    %53 = vector.broadcast %38 : vector<8x1xf32> to vector<8x128xf32>
    %54 = vector.broadcast %42 : vector<1x128xf32> to vector<8x128xf32>
    %55 = arith.subf %53, %54 : vector<8x128xf32>
    %56 = math.absf %55 : vector<8x128xf32>
    %57 = arith.addf %52, %56 : vector<8x128xf32>
    %58 = vector.broadcast %39 : vector<8x1xf32> to vector<8x128xf32>
    %59 = vector.broadcast %43 : vector<1x128xf32> to vector<8x128xf32>
    %60 = arith.subf %58, %59 : vector<8x128xf32>
    %61 = math.absf %60 : vector<8x128xf32>
    %62 = arith.addf %57, %61 : vector<8x128xf32>
    %cst_19 = arith.constant 1.000000e+00 : f32
    %63 = vector.broadcast %cst_19 : f32 to vector<8x128xf32>
    %64 = arith.mulf %63, %62 : vector<8x128xf32>
    %65 = arith.addf %31, %64 : vector<8x128xf32>
    %cst_20 = arith.constant 5.000000e-01 : f32
    %66 = vector.broadcast %cst_20 : f32 to vector<8x1xf32>
    %67 = arith.mulf %66, %38 : vector<8x1xf32>
    %68 = arith.subf %36, %67 : vector<8x1xf32>
    %cst_21 = arith.constant 5.000000e-01 : f32
    %69 = vector.broadcast %cst_21 : f32 to vector<8x1xf32>
    %70 = arith.mulf %69, %39 : vector<8x1xf32>
    %71 = arith.subf %37, %70 : vector<8x1xf32>
    %cst_22 = arith.constant 5.000000e-01 : f32
    %72 = vector.broadcast %cst_22 : f32 to vector<8x1xf32>
    %73 = arith.mulf %72, %38 : vector<8x1xf32>
    %74 = arith.addf %36, %73 : vector<8x1xf32>
    %cst_23 = arith.constant 5.000000e-01 : f32
    %75 = vector.broadcast %cst_23 : f32 to vector<8x1xf32>
    %76 = arith.mulf %75, %39 : vector<8x1xf32>
    %77 = arith.addf %37, %76 : vector<8x1xf32>
    %cst_24 = arith.constant 5.000000e-01 : f32
    %78 = vector.broadcast %cst_24 : f32 to vector<1x128xf32>
    %79 = arith.mulf %78, %42 : vector<1x128xf32>
    %80 = arith.subf %40, %79 : vector<1x128xf32>
    %cst_25 = arith.constant 5.000000e-01 : f32
    %81 = vector.broadcast %cst_25 : f32 to vector<1x128xf32>
    %82 = arith.mulf %81, %43 : vector<1x128xf32>
    %83 = arith.subf %41, %82 : vector<1x128xf32>
    %cst_26 = arith.constant 5.000000e-01 : f32
    %84 = vector.broadcast %cst_26 : f32 to vector<1x128xf32>
    %85 = arith.mulf %84, %42 : vector<1x128xf32>
    %86 = arith.addf %40, %85 : vector<1x128xf32>
    %cst_27 = arith.constant 5.000000e-01 : f32
    %87 = vector.broadcast %cst_27 : f32 to vector<1x128xf32>
    %88 = arith.mulf %87, %43 : vector<1x128xf32>
    %89 = arith.addf %41, %88 : vector<1x128xf32>
    %90 = vector.broadcast %74 : vector<8x1xf32> to vector<8x128xf32>
    %91 = vector.broadcast %86 : vector<1x128xf32> to vector<8x128xf32>
    %92 = arith.minimumf %90, %91 : vector<8x128xf32>
    %93 = vector.broadcast %68 : vector<8x1xf32> to vector<8x128xf32>
    %94 = vector.broadcast %80 : vector<1x128xf32> to vector<8x128xf32>
    %95 = arith.maximumf %93, %94 : vector<8x128xf32>
    %96 = arith.subf %92, %95 : vector<8x128xf32>
    %cst_28 = arith.constant 0.000000e+00 : f32
    %97 = vector.broadcast %cst_28 : f32 to vector<8x128xf32>
    %98 = arith.maximumf %96, %97 : vector<8x128xf32>
    %99 = vector.broadcast %77 : vector<8x1xf32> to vector<8x128xf32>
    %100 = vector.broadcast %89 : vector<1x128xf32> to vector<8x128xf32>
    %101 = arith.minimumf %99, %100 : vector<8x128xf32>
    %102 = vector.broadcast %71 : vector<8x1xf32> to vector<8x128xf32>
    %103 = vector.broadcast %83 : vector<1x128xf32> to vector<8x128xf32>
    %104 = arith.maximumf %102, %103 : vector<8x128xf32>
    %105 = arith.subf %101, %104 : vector<8x128xf32>
    %cst_29 = arith.constant 0.000000e+00 : f32
    %106 = vector.broadcast %cst_29 : f32 to vector<8x128xf32>
    %107 = arith.maximumf %105, %106 : vector<8x128xf32>
    %108 = arith.mulf %98, %107 : vector<8x128xf32>
    %109 = arith.mulf %38, %39 : vector<8x1xf32>
    %110 = arith.mulf %42, %43 : vector<1x128xf32>
    %111 = vector.broadcast %109 : vector<8x1xf32> to vector<8x128xf32>
    %112 = vector.broadcast %110 : vector<1x128xf32> to vector<8x128xf32>
    %113 = arith.addf %111, %112 : vector<8x128xf32>
    %114 = arith.subf %113, %108 : vector<8x128xf32>
    %115 = vector.broadcast %74 : vector<8x1xf32> to vector<8x128xf32>
    %116 = vector.broadcast %86 : vector<1x128xf32> to vector<8x128xf32>
    %117 = arith.maximumf %115, %116 : vector<8x128xf32>
    %118 = vector.broadcast %68 : vector<8x1xf32> to vector<8x128xf32>
    %119 = vector.broadcast %80 : vector<1x128xf32> to vector<8x128xf32>
    %120 = arith.minimumf %118, %119 : vector<8x128xf32>
    %121 = arith.subf %117, %120 : vector<8x128xf32>
    %cst_30 = arith.constant 0.000000e+00 : f32
    %122 = vector.broadcast %cst_30 : f32 to vector<8x128xf32>
    %123 = arith.maximumf %121, %122 : vector<8x128xf32>
    %124 = vector.broadcast %77 : vector<8x1xf32> to vector<8x128xf32>
    %125 = vector.broadcast %89 : vector<1x128xf32> to vector<8x128xf32>
    %126 = arith.maximumf %124, %125 : vector<8x128xf32>
    %127 = vector.broadcast %71 : vector<8x1xf32> to vector<8x128xf32>
    %128 = vector.broadcast %83 : vector<1x128xf32> to vector<8x128xf32>
    %129 = arith.minimumf %127, %128 : vector<8x128xf32>
    %130 = arith.subf %126, %129 : vector<8x128xf32>
    %cst_31 = arith.constant 0.000000e+00 : f32
    %131 = vector.broadcast %cst_31 : f32 to vector<8x128xf32>
    %132 = arith.maximumf %130, %131 : vector<8x128xf32>
    %133 = arith.mulf %123, %132 : vector<8x128xf32>
    %134 = tpu.reciprocal %114 {approx = true} : vector<8x128xf32> -> vector<8x128xf32>
    %135 = tpu.reciprocal %133 {approx = true} : vector<8x128xf32> -> vector<8x128xf32>
    %136 = arith.subf %133, %114 : vector<8x128xf32>
    %137 = arith.mulf %136, %135 : vector<8x128xf32>
    %138 = arith.mulf %108, %134 : vector<8x128xf32>
    %139 = arith.subf %137, %138 : vector<8x128xf32>
    %cst_32 = arith.constant 1.000000e+00 : f32
    %140 = vector.broadcast %cst_32 : f32 to vector<8x128xf32>
    %141 = arith.mulf %140, %139 : vector<8x128xf32>
    %142 = arith.addf %65, %141 : vector<8x128xf32>
    %c0_33 = arith.constant 0 : index
    %c0_34 = arith.constant 0 : index
    %c0_35 = arith.constant 0 : index
    %143 = vector.load %arg6[%c0_33, %c0_34, %c0_35] : memref<1x8x128xf32, #tpu.memory_space<vmem>>, vector<1x8x128xf32>
    %144 = vector.shape_cast %143 : vector<1x8x128xf32> to vector<8x128xf32>
    %145 = vector.shape_cast %142 : vector<8x128xf32> to vector<1x8x128xf32>
    tpu.vector_store %arg6[%c0_33, %c0_34, %c0_35], %145 {strides = array<i32>} : memref<1x8x128xf32, #tpu.memory_space<vmem>>, vector<1x8x128xf32>,
    return
  }
  func.func @transform_0(%arg0: i32, %arg1: i32) -> (i32, i32, i32) {
    %c0_i32 = arith.constant 0 : i32
    %c0_i32_0 = arith.constant 0 : i32
    return %arg0, %arg1, %c0_i32 : i32, i32, i32
  }
  func.func @transform_1(%arg0: i32, %arg1: i32) -> (i32, i32, i32) {
    %c0_i32 = arith.constant 0 : i32
    %c0_i32_0 = arith.constant 0 : i32
    return %arg0, %arg1, %c0_i32 : i32, i32, i32
  }
  func.func @transform_2(%arg0: i32, %arg1: i32) -> (i32, i32, i32) {
    %c0_i32 = arith.constant 0 : i32
    %c0_i32_0 = arith.constant 0 : i32
    %c0_i32_1 = arith.constant 0 : i32
    return %arg0, %c0_i32, %c0_i32_0 : i32, i32, i32
  }
  func.func @transform_3(%arg0: i32, %arg1: i32) -> (i32, i32, i32) {
    %c0_i32 = arith.constant 0 : i32
    %c0_i32_0 = arith.constant 0 : i32
    %c0_i32_1 = arith.constant 0 : i32
    return %arg0, %c0_i32, %c0_i32_0 : i32, i32, i32
  }
  func.func @transform_4(%arg0: i32, %arg1: i32) -> (i32, i32, i32) {
    %c0_i32 = arith.constant 0 : i32
    %c0_i32_0 = arith.constant 0 : i32
    return %arg0, %arg1, %c0_i32 : i32, i32, i32
  }
}

</mosaic_0001>

<bundles_post_ra>
// kernel: tpu_custom_call.1
= control target key start
LH: loop header
LB: loop body
LE: loop exit
PB: predicated region body
PF: predicated region fallthrough
CT: control target
= control target key end

     0   :  { %s1284_s0 = inlined_call_operand.vmem [shape: f32[2,8,128], index: 0, kind: input, shape index: {}]   ;;  %s1285_s1 = inlined_call_operand.vmem [shape: f32[2,8,4], index: 1, kind: input, shape index: {}]   ;;  %s1286_s2 = inlined_call_operand.hbm [shape: bf16[2,128,128], index: 2, kind: input, shape index: {}]   ;;  %s1287_s3 = inlined_call_operand.hbm [shape: f32[2,8,128], index: 3, kind: input, shape index: {}]   ;;  %s1288_s4 = inlined_call_operand.hbm [shape: f32[2,8,128], index: 4, kind: output, shape index: {}]  }
   0x1   :  { %1290 = sst [smem:[#allocation12_spill]] %s1286_s2 }
   0x2   :  { %9 = vsyncpa [#allocation3], 0 }
   0x3   :  { %11 = vsyncpa [#allocation3 + $0x1], 0 }
   0x4   :  { %12 = vsyncpa [#allocation6], 0 }
   0x5   :  { %14 = vsyncpa [#allocation6 + $0x1], 0 }
   0x6   :  { %15 = vsyncpa [#allocation4], 0 }
   0x7   :  { %17 = vsyncpa [#allocation4 + $0x1], 0  ;;  %s1081_s15 = smov 0   ;;  %s1083_s16 = smov 0  }
   0x8   :  { %s1085_s17 = smov 0   ;;  %s1087_s18 = smov 0  }
   0x9   :  { %s1089_s19 = smov 0   ;;  %s1091_s20 = smov 0  }
   0xa LB: > { %s737_s21 = sadd.s32 4294967295, %s1041_s20   ;;  %s738_s22 = sadd.s32 4294967294, %s1041_s20   ;;  %s1041_s20 = sphi %s1091_s20, %s23_s20   ;;  %s1037_s19 = sphi %s1089_s19, %s1305_s19   ;;  %s1033_s18 = sphi %s1087_s18, %s1304_s18   ;;  %s1029_s17 = sphi %s1085_s17, %s1303_s17   ;;  %s1025_s16 = sphi %s1083_s16, %s1302_s16   ;;  %s1021_s15 = sphi %s1081_s15, %s1301_s15  }
   0xb   : > { %s35_s23 = sadd.s32 1, %s1037_s19  ;;  %s98_s24 = sadd.s32 1, %s1029_s17 }
   0xc   : > { %p37_p0 = scmp.ge.s32.totalorder %s35_s23, 2  ;;  %p105_p1 = scmp.ne.s32.totalorder %s1029_s17, %s1025_s16 }
   0xd   : > { %p106_p2 = scmp.eq.s32.totalorder %s1041_s20, 0  ;;  %p111_p3 = scmp.ne.s32.totalorder %s1025_s16, %s1021_s15 }
   0xe   : > { %s1307_s23 = smov (%p37_p0, %s35_s23), 0  ;;  %p112_p5 = scmp.eq.s32.totalorder %s737_s21, 0 }
   0xf   : > { %1291 = sst [smem:[#allocation11_spill]] %s1307_s23  ;;  %p1122_p4 = por %p106_p2, %p105_p1 }
  0x10   : > { %s95_s26 = ssub.s32 %s1037_s19, %s1307_s23  ;;  %p163_p6 = scmp.eq.s32.totalorder %s737_s21, 1 }
  0x11   : > { %p96_p7 = scmp.eq.s32.totalorder %s95_s26, 0  ;;  %p1128_p8 = por %p112_p5, %p111_p3 }
  0x12   : > { %p1132_p9 = por %p163_p6, %p105_p1  ;;  %p169_p10 = scmp.eq.s32.totalorder %s738_s22, 1 }
  0x13   : > { %s1137_s29 = scalar_select %p96_p7, %s1029_s17, %s98_s24  }
  0x14   : > { %p1139_p11 = por %p169_p10, %p111_p3  ;;  %p812_p13 = scmp.lt.s32.totalorder %s1041_s20, 2 }
  0x15   : > { %s1146_s5 = sand.u32 1, %s1029_s17   ;;  %s765_s7 = sshll.u32 %s1037_s19, 10 }
  0x16   : > { %s741_s6 = sshll.u32 %s1146_s5, 6  ;;  %s1296_s2 = sld [smem:[#allocation12_spill]] }
  0x17   : > { %s213_s11 = scalar_lea.vmem [#allocation2], %s741_s6  ;;  %p1155_p0 = pnand %p812_p13, %p1122_p4 }
  0x18   : > { %s220_s12 = sshll.u32 %s213_s11, 4  ;;  %p746_p1 = scmp.ge.s32.totalorder %s1041_s20, 1  ;;  %s221_s12 = int_to_ptr.vmem [resolvable:$true] %s220_s12 }
  0x19   : > { %s210_s14 = scalar_lea.sflag [#allocation3], %s1146_s5  ;;  %p903_p2 = pneg %p1155_p0 }
  0x1a   : > { %s914_s21 = scalar_lea.vmem %s221_s12, 1024  ;;  %s1043_s22 = smov [#allocation2]  }
  0x1b   : > { %p915_p3 = scmp.ne.s32.totalorder %s221_s12, %s914_s21  ;;  %s919_s24 = sshll.u32 %s1043_s22, 4  ;;  %s920_s24 = int_to_ptr.vmem [resolvable:$false] %s919_s24 }
  0x1c   : > { %s219_s10 = scalar_lea.hbm %s1296_s2, %s765_s7  ;;  %s921_s25 = scalar_lea.vmem %s920_s24, 2048 }
  0x1d   : > { %p917_p5 = pnand %p915_p3, %p903_p2  ;;  %p922_p4 = scmp.lt.s32.totalorder %s221_s12, %s920_s24 }
  0x1e   : > { %p923_p7 = scmp.lt.s32.totalorder %s921_s25, %s914_s21 }
  0x1f   : > { %p918_p6 = pneg %p917_p5 }
  0x20   : > { %p924_p10 = por %p923_p7, %p922_p4 }
  0x22   : > { %p925_p13 = pnand %p924_p10, %p918_p6 }
  0x24   : > { %928 = shalt.err (!%p925_p13)
}
  0x25   : > { %s1044_s26 = smov 64   ;;  %s1045_s6 = smov 4  }
  0x26   : > { %804 = dma.hbm_to_vmem [thread:$0]  (!%p1155_p0), %s219_s10, 1024, %s221_s12, %s210_s14, %s1044_s26, %s1044_s26, %s1045_s6  }
  0x27   : > { %p246_p3 = scmp.lt.s32.totalorder %s1041_s20, 3  ;;  %s744_s7 = sshll.u32 %s1146_s5, 3 }
  0x28   : > { %s745_s8 = sshll.u32 %s1037_s19, 7  ;;  %s234_s24 = scalar_lea.vmem [#allocation5], %s744_s7 }
  0x29   : > { %p1173_p5 = pnand %p746_p1, %p246_p3  ;;  %s239_s22 = scalar_lea.hbm %s1287_s3, %s745_s8 }
  0x2a   : > { %s241_s25 = sshll.u32 %s234_s24, 4  ;;  %s231_s2 = scalar_lea.sflag [#allocation6], %s1146_s5  ;;  %s242_s25 = int_to_ptr.vmem [resolvable:$true] %s241_s25 }
  0x2b   : > { %s942_s23 = scalar_lea.vmem %s242_s25, 128  ;;  %s1046_s10 = smov [#allocation5]  }
  0x2c   : > { %p943_p6 = scmp.ne.s32.totalorder %s242_s25, %s942_s23  ;;  %s947_s12 = sshll.u32 %s1046_s10, 4  ;;  %s948_s12 = int_to_ptr.vmem [resolvable:$false] %s947_s12 }
  0x2d   : > { %s949_s14 = scalar_lea.vmem %s948_s12, 256  ;;  %p950_p1 = scmp.lt.s32.totalorder %s242_s25, %s948_s12 }
  0x2e   : > { %p945_p4 = pnand %p943_p6, %p903_p2  ;;  %p951_p10 = scmp.lt.s32.totalorder %s949_s14, %s942_s23 }
  0x30   : > { %p946_p7 = pneg %p945_p4  ;;  %p952_p13 = por %p951_p10, %p950_p1 }
  0x32   : > { %p953_p3 = pnand %p952_p13, %p946_p7 }
  0x34   : > { %956 = shalt.err (!%p953_p3)
}
  0x35   : > { %807 = dma.hbm_to_vmem [thread:$0]  (!%p1155_p0), %s239_s22, 128, %s242_s25, %s231_s2  }
  0x36   : > { %250 = sbr.rel (%p1173_p5) target bundleno = 365 (0x16d), region = 36  ;;  %s1189_s5 = sand.u32 (!%p1173_p5), 1, %s1025_s16  }
  0x37   : > { %s747_s26 = sshll.u32 (!%p1173_p5), %s1189_s5, 6  ;;  %s253_s6 = scalar_lea.sflag (!%p1173_p5), [#allocation3], %s1189_s5 }
  0x38   : > { %s1193_s7 = scalar_lea.vmem (!%p1173_p5), [#allocation2], %s747_s26 }
  0x3b   : > { %1008 = dma.done.wait (%p1128_p8), %s253_s6, 1024  }
  0x3c   : > { %1010 = vsyncadd (%p1128_p8), %s253_s6, 4294966272  ;;  %s748_s2 = sshll.u32 %s1189_s5, 3  ;;  %s262_s23 = scalar_lea.sflag [#allocation6], %s1189_s5 }
  0x3d   : > { %s1203_s13 = scalar_lea.vmem [#allocation5], %s748_s2 }
  0x3e   : > { %1012 = dma.done.wait (%p1128_p8), %s262_s23, 128  }
  0x3f   : > { %1014 = vsyncadd (%p1128_p8), %s262_s23, 4294967168  ;;  %p309_p0 = scmp.lt.s32.totalorder %s1033_s18, 1  ;;  %v1047_v0 = vmov 0.0   ;;  %vm1048_vm0 = vmmov 0   ;;  %v1049_v1 = vmov 1   ;;  %v1050_v2 = vmov 0  }
  0x40   : > { %775 = vmatprep.subr.bf16.mxu0 %v1047_v0  ;;  %791 = vmatprep.mubr.msk.bf16.mxu0 %vm1048_vm0, %v1047_v0  ;;  %v881_v7 = vld [vmem:[%s1193_s7 + $0x38] sm:$0xff]   ;;  %s1051_s10 = smov 126   ;;  %v882_v8 = vld [vmem:[%s1193_s7 + $0x30] sm:$0xff]   ;;  %s1052_s12 = smov 127   ;;  %v883_v9 = vld [vmem:[%s1193_s7 + $0x28] sm:$0xff]   ;;  %v1053_v39 = vmov 3   ;;  %v371_v43 = vlaneseq }
  0x41   : > { %s310_s8 = scalar_select %p309_p0, %s1033_s18, 1  ;;  %873 = vset.pattern.permute.xlu0 %v1049_v1  ;;  %872 = vset.pattern.permute.xlu1 %v1050_v2  ;;  %v884_v10 = vld [vmem:[%s1193_s7 + $0x20] sm:$0xff]   ;;  %v885_v11 = vld [vmem:[%s1193_s7 + $0x18] sm:$0xff]   ;;  %v886_v14 = vld [vmem:[%s1193_s7 + $0x10] sm:$0xff]   ;;  %v1054_v41 = vmov 2  }
  0x42   : > { %776 = vmatpush3.bf16.msra.mxu0 %v881_v7  ;;  %v887_v15 = vld [vmem:[%s1193_s7 + $0x8] sm:$0xff]   ;;  %v888_v16 = vld [vmem:[%s1193_s7] sm:$0xff]   ;;  %v372_v45 = vshrl.u32 %v371_v43, 7  ;;  %s762_s14 = sshll.u32 %s1033_s18, 7  ;;  %s308_s26 = scalar_lea.vmem [#allocation7], %s748_s2 }
  0x43   : > { %s750_s9 = sshll.u32 %s310_s8, 3  ;;  %777 = vmatprep.subr.bf16.mxu0 %v1047_v0  ;;  %v365_v42 = vld [vmem:[%s1203_s13] sm:$0xff]  ;;  %s605_s6 = sshll.u32 %s308_s26, 4  ;;  %s606_s6 = int_to_ptr.vmem [resolvable:$true] %s605_s6 }
  0x44   : > { %s315_s21 = scalar_lea.vmem %s1284_s0, %s750_s9  ;;  %s322_s25 = scalar_lea.vmem %s1285_s1, %s750_s9  ;;  %v505_v44 = vmul.f32 0.5, %v365_v42  ;;  %v373_v48 = vsub.s32 0, %v372_v45  ;;  %v383_v51 = vsub.s32 1, %v372_v45  ;;  %v559_v53 = vrot.slane %v365_v42, 1 }
  0x45   : > { %v1219_v3 = vld [vmem:[%s322_s25] sm:$0xff]  ;;  %v394_v61 = vsub.s32 2, %v372_v45  ;;  %s603_s13 = scalar_lea.hbm %s1288_s4, %s762_s14  ;;  %s591_s8 = scalar_lea.sflag [#allocation4], %s1189_s5 }
  0x46   : > { %v340_v4 = vld [vmem:[%s315_s21] sm:$0xff]  ;;  %v498_v5 = vmul.f32 0.5, %v1219_v3  ;;  %778 = vmatpush3.bf16.msra.mxu0 %v882_v8  ;;  %v507_v46 = vrot.slane %v505_v44, 2  ;;  %v561_v62 = vmul.f32 %v559_v53, %v365_v42  ;;  %s957_s9 = scalar_lea.vmem %s606_s6, 128  ;;  %s1055_s11 = smov [#allocation7]  }
  0x47   : > { %v752_v6 = vmul.f32 -1.442695, %v340_v4  ;;  %779 = vmatprep.subr.bf16.mxu0 %v1047_v0  ;;  %p958_p8 = scmp.ne.s32.totalorder %s606_s6, %s957_s9  ;;  %s961_s18 = sshll.u32 %s1055_s11, 4  ;;  %s962_s18 = int_to_ptr.vmem [resolvable:$false] %s961_s18 }
  0x48   : > { %500 = vrot.lane.b32.xlu0 %v498_v5, %s1051_s10  ;;  %v509_v47 = vsub.f32 %v365_v42, %v507_v46  ;;  %v510_v49 = vadd.f32 %v507_v46, %v365_v42  ;;  %s963_s2 = scalar_lea.vmem %s962_s18, 256  ;;  %p964_p6 = scmp.lt.s32.totalorder %s606_s6, %s962_s18 }
  0x49   : > { %889 = vpow2.f32 %v752_v6  ;;  %p959_p2 = pnand %p958_p8, %p1132_p9  ;;  %p965_p4 = scmp.lt.s32.totalorder %s963_s2, %s957_s9 }
  0x4a   : > { %780 = vmatpush3.bf16.msra.mxu0 %v883_v9  ;;  %v529_v52 = vrot.slane %v509_v47, %v373_v48  ;;  %v519_v54 = vrot.slane %v510_v49, %v373_v48  ;;  %v540_v56 = vrot.slane %v510_v49, %v383_v51  ;;  %v549_v60 = vrot.slane %v509_v47, %v383_v51 }
  0x4b   : > { %781 = vmatprep.subr.bf16.mxu0 %v1047_v0  ;;  %v570_v9 = vrot.slane %v561_v62, %v394_v61  ;;  %p960_p5 = pneg %p959_p2  ;;  %p966_p7 = por %p965_p4, %p964_p6 }
  0x4c   : > { %554 = vrot.lane.b32.xlu0 %v1219_v3, %s1052_s12 }
  0x4d   : > { %p967_p1 = pnand %p966_p7, %p960_p5 }
  0x4e   : > { %782 = vmatpush3.bf16.msra.mxu0 %v884_v10 }
  0x4f   : > { %783 = vmatprep.subr.bf16.mxu0 %v1047_v0 }
  0x52   : > { %784 = vmatpush3.bf16.msra.mxu0 %v885_v11 }
  0x53   : > { %785 = vmatprep.subr.bf16.mxu0 %v1047_v0 }
  0x56   : > { %v890_v12 = vpop.eup %889  ;;  %786 = vmatpush3.bf16.msra.mxu0 %v886_v14 }
  0x57   : > { %v344_v13 = vadd.f32 1.0, %v890_v12  ;;  %787 = vmatprep.subr.bf16.mxu0 %v1047_v0 }
  0x59   : > { %891 = vrcp.f32 %v344_v13  ;;  %v374_v13 = vrot.slane %v365_v42, %v373_v48 }
  0x5a   : > { %788 = vmatpush3.bf16.msra.mxu0 %v887_v15 }
  0x5b   : > { %789 = vmatprep.subr.bf16.mxu0 %v1047_v0 }
  0x5e   : > { %790 = vmatpush3.bf16.msra.mxu0 %v888_v16 }
  0x66   : > { %v892_v17 = vpop.eup %891 }
  0x67   : > { %v347_v18 = vsub.f32 1.0, %v892_v17  ;;  %v350_v19 = vadd.f32 1e-08, %v892_v17  ;;  %v355_v22 = vmul.f32 %v892_v17, %v892_v17 }
  0x69   : > { %893 = vlog2.f32 %v350_v19  ;;  %v357_v20 = vadd.f32 1e-08, %v347_v18  ;;  %v348_v21 = vmul.f32 %v347_v18, %v347_v18  ;;  %v356_v28 = vmul.f32 0.75, %v355_v22 }
  0x6b   : > { %895 = vlog2.f32 %v357_v20  ;;  %v349_v24 = vmul.f32 0.25, %v348_v21 }
  0x76   : > { %v894_v23 = vpop.eup %893 }
  0x77   : > { %v352_v25 = vmul.f32 0.6931472, %v894_v23 }
  0x78   : > { %v896_v26 = vpop.eup %895 }
  0x79   : > { %v353_v27 = vsub.f32 0.0, %v352_v25  ;;  %v359_v29 = vmul.f32 0.6931472, %v896_v26  ;;  %v405_v25 = vsub.s32 3, %v372_v45 }
  0x7b   : > { %v354_v30 = vmul.f32 %v353_v27, %v349_v24  ;;  %v360_v31 = vsub.f32 0.0, %v359_v29  ;;  %v384_v24 = vrot.slane %v365_v42, %v383_v51 }
  0x7d   : > { %v361_v32 = vmul.f32 %v360_v31, %v356_v28  ;;  %v406_v31 = vrot.slane %v365_v42, %v405_v25 }
  0x7f   : > { %v362_v33 = vsub.f32 %v354_v30, %v361_v32 }
  0x81   : > { %v363_v34 = vpack.c.bf16 %v362_v33, %v362_v33  ;;  %v395_v33 = vrot.slane %v365_v42, %v394_v61 }
  0x83   : > { %792 = vmatmul.mubr.bf16.vlgmr.msra.gmra.mxu0 %v363_v34 }
  0xba   : > { %v501_v35 = vpop.permute.xlu0 %500 }
  0xbb   : > { %v504_v36 = vadd.f32 %v501_v35, %v1219_v3  ;;  %v503_v37 = vsub.f32 %v1219_v3, %v501_v35 }
  0xbd   : > { %534 = vperm.xlu0 %873, %v504_v36   ;;  %513 = vperm.xlu1 %872, %v504_v36  }
  0xbe   : > { %v555_v38 = vpop.permute.xlu0 %554 }
  0xbf   : > { %v557_v40 = vmul.f32 %v555_v38, %v1219_v3 }
  0xc1   : > { %523 = vperm.xlu1 %872, %v503_v37   ;;  %876 = vset.pattern.permute.xlu0 %v1050_v2 }
  0xc2   : > { %368 = vperm.xlu0 %876, %v1219_v3  }
  0xc5   : > { %874 = vset.pattern.permute.xlu1 %v1049_v1 }
  0xc6   : > { %543 = vperm.xlu1 %874, %v503_v37   ;;  %879 = vset.pattern.permute.xlu0 %v1053_v39 }
  0xc7   : > { %400 = vperm.xlu0 %879, %v1219_v3  }
  0xca   : > { %875 = vset.pattern.permute.xlu1 %v1054_v41 }
  0xcb   : > { %564 = vperm.xlu1 %875, %v557_v40   ;;  %880 = vset.pattern.permute.xlu0 %v1054_v41 }
  0xcf   : > { %877 = vset.pattern.permute.xlu1 %v1049_v1 }
  0xd0   : > { %378 = vperm.xlu1 %877, %v1219_v3  }
  0xd4   : > { %878 = vset.pattern.permute.xlu1 %v1054_v41 }
  0xd5   : > { %389 = vperm.xlu1 %878, %v1219_v3  }
 0x138   : > { %v514_v50 = vpop.permute.xlu1 %513  ;;  %v535_v57 = vpop.permute.xlu0 %534 }
 0x139   : > { %v520_v63 = vmin.f32 %v514_v50, %v519_v54  ;;  %v573_v0 = vmax.f32 %v514_v50, %v519_v54  ;;  %v541_v1 = vmin.f32 %v535_v57, %v540_v56  ;;  %v577_v2 = vmax.f32 %v535_v57, %v540_v56 }
 0x13c   : > { %v524_v55 = vpop.permute.xlu1 %523 }
 0x13d   : > { %v530_v58 = vmax.f32 %v524_v55, %v529_v52  ;;  %v574_v59 = vmin.f32 %v524_v55, %v529_v52  ;;  %v369_v14 = vpop.permute.xlu0 %368 }
 0x13e   : > { %v375_v27 = vsub.f32 %v369_v14, %v374_v13 }
 0x13f   : > { %v531_v4 = vsub.f32 %v520_v63, %v530_v58  ;;  %v575_v5 = vsub.f32 %v573_v0, %v574_v59 }
 0x140   : > { %v376_v32 = vand.u32 2147483647, %v375_v27 }
 0x141   : > { %v544_v3 = vpop.permute.xlu1 %543  ;;  %v532_v15 = vmax.f32 %v531_v4, 0.0  ;;  %v576_v16 = vmax.f32 %v575_v5, 0.0 }
 0x142   : > { %v550_v6 = vmax.f32 %v544_v3, %v549_v60  ;;  %v578_v7 = vmin.f32 %v544_v3, %v549_v60  ;;  %v401_v34 = vpop.permute.xlu0 %400 }
 0x143   : > { %v492_v8 = vpop.f32.mrf.mxu0  ;;  %v407_v37 = vsub.f32 %v401_v34, %v406_v31 }
 0x144   : > { %v551_v10 = vsub.f32 %v541_v1, %v550_v6  ;;  %v579_v11 = vsub.f32 %v577_v2, %v578_v7 }
 0x145   : > { %v793_v12 = vpop.f32.mrf.mxu0  ;;  %v408_v41 = vand.u32 2147483647, %v407_v37 }
 0x146   : > { %v552_v17 = vmax.f32 %v551_v10, 0.0  ;;  %v580_v18 = vmax.f32 %v579_v11, 0.0  ;;  %v565_v19 = vpop.permute.xlu1 %564 }
 0x147   : > { %v495_v20 = vpop.f32.mrf.mxu0  ;;  %v571_v21 = vadd.f32 %v570_v9, %v565_v19 }
 0x148   : > { %v581_v22 = vmul.f32 %v580_v18, %v576_v16  ;;  %v553_v23 = vmul.f32 %v552_v17, %v532_v15 }
 0x149   : > { %v794_v26 = vpop.f32.mrf.mxu0 }
 0x14a   : > { %897 = vrcp.f32 %v581_v22  ;;  %v572_v28 = vsub.f32 %v571_v21, %v553_v23 }
 0x14b   : > { %v379_v29 = vpop.permute.xlu1 %378 }
 0x14c   : > { %899 = vrcp.f32 %v572_v28  ;;  %v385_v30 = vsub.f32 %v379_v29, %v384_v24  ;;  %v584_v45 = vsub.f32 %v581_v22, %v572_v28 }
 0x14e   : > { %v386_v35 = vand.u32 2147483647, %v385_v30 }
 0x150   : > { %v390_v36 = vpop.permute.xlu1 %389  ;;  %v387_v38 = vadd.f32 %v386_v35, %v376_v32 }
 0x151   : > { %v396_v39 = vsub.f32 %v390_v36, %v395_v33 }
 0x153   : > { %v397_v40 = vand.u32 2147483647, %v396_v39 }
 0x155   : > { %v398_v43 = vadd.f32 %v397_v40, %v387_v38 }
 0x157   : > { %v898_v44 = vpop.eup %897  ;;  %v409_v46 = vadd.f32 %v408_v41, %v398_v43 }
 0x158   : > { %v585_v48 = vmul.f32 %v898_v44, %v584_v45 }
 0x159   : > { %v900_v47 = vpop.eup %899  ;;  %v493_v42 = vadd.f32 %v492_v8, %v409_v46 }
 0x15a   : > { %v586_v49 = vmul.f32 %v900_v47, %v553_v23 }
 0x15c   : > { %v587_v50 = vsub.f32 %v585_v48, %v586_v49 }
 0x15e   : > { %v588_v51 = vadd.f32 %v587_v50, %v493_v42 }
 0x160   : > { %589 = vst [vmem:[%s308_s26] sm:$0xff] %v588_v51 }
 0x161   : > { %970 = shalt.err (!%p967_p1)
}
 0x162   : > { %s971_s27 = scalar_lea.hbm %s603_s13, 128  ;;  %s975_s22 = scalar_lea.hbm %s1288_s4, 256 }
 0x163   : > { %p972_p10 = scmp.ne.s32.totalorder %s603_s13, %s971_s27  ;;  %p976_p0 = scmp.lt.s32.totalorder %s603_s13, %s1288_s4 }
 0x164   : > { %p977_p8 = scmp.lt.s32.totalorder %s975_s22, %s971_s27 }
 0x165   : > { %p973_p13 = pnand %p972_p10, %p1132_p9 }
 0x166   : > { %p978_p2 = por %p977_p8, %p976_p0 }
 0x167   : > { %p974_p3 = pneg %p973_p13 }
 0x169   : > { %p979_p12 = pnand %p978_p2, %p974_p3 }
 0x16b   : > { %982 = shalt.err (!%p979_p12)
}
 0x16c   : > { %799 = dma.vmem_to_hbm [thread:$0]  (%p1132_p9), %s606_s6, 128, %s603_s13, %s591_s8  }
 0x16d PF: > { %s617_s10 = sand.u32 1, %s1021_s15   ;;  %p1299_p5 = scmp.ge.s32.totalorder %s1041_s20, 2 }
 0x16e   : > { %s618_s12 = scalar_lea.sflag [#allocation4], %s617_s10 }
 0x16f   : > { %p809_p6 = pnand %p1299_p5, %p1139_p11 }
 0x171   : > { %p810_p4 = pneg %p809_p6 }
 0x173   : > { %1016 = dma.done.wait (%p810_p4), %s618_s12, 128  }
 0x174   : > { %1018 = vsyncadd (%p810_p4), %s618_s12, 4294967168  ;;  %s23_s20 = sadd.s32 1, %s1041_s20   ;;  %s1300_s28 = sld [smem:[#allocation11_spill]] }
 0x175   : > { %p20_p7 = scmp.ge.s32.totalorder %s23_s20, 4   ;;  %s1301_s15 = smov %s1025_s16 }
 0x176   : > { %s1302_s16 = smov %s1029_s17  ;;  %s1303_s17 = smov %s1137_s29 }
 0x177   : > { %s1304_s18 = smov %s1037_s19  ;;  %22 = sbr.rel (!%p20_p7) target bundleno = 10 (0xa), region = 100 }
 0x17a   : > { %s1305_s19 = smov %s1300_s28 }
 0x17c   :  { %623 = vsyncpa [#allocation3], 1 }
 0x17d   :  { %625 = vsyncpa [#allocation3 + $0x1], 1 }
 0x17e   :  { %626 = vsyncpa [#allocation6], 1 }
 0x17f   :  { %628 = vsyncpa [#allocation6 + $0x1], 1 }
 0x180   :  { %629 = vsyncpa [#allocation4], 1 }
 0x181   :  { %631 = vsyncpa [#allocation4 + $0x1], 1 }

</bundles_post_ra>
